<compile_context>
chip_gen: v5e
topology: v5e:2x2
jax: 0.10.0
libtpu: 0.0.40
codegen_flags: <defaults>
</compile_context>

<pallas_src>
import jax
import jax.numpy as jnp
from jax.experimental import pallas as pl
from jax.experimental.pallas import tpu as pltpu

NUM_CLASSES = 10
_LANES = 128


def _round_up(n, m):
    return (n + m - 1) // m * m


def _choose_k_tiling(d, max_tk=8192):
    """Pick the K tile. Single-shot when D fits one tile; else big tiles.

    Per-buffer footprint at tk=8192 is ~2 MB (bf16 w tile) + tiny x tile, well
    inside the 32 MiB scoped VMEM default on v5e/v6e/v7x with double-buffering.
    """
    if d <= max_tk:
        tk = _round_up(d, 512)
        return tk, tk
    return max_tk, _round_up(d, max_tk)


def prepare_classifier_params(w, b, *, max_tk=8192):
    """One-time (model-init) weight prep: pad + cast to bf16, OUT of the hot path."""
    d, nc = w.shape
    tk, d_pad = _choose_k_tiling(d, max_tk)
    nc_pad = _round_up(max(nc, _LANES), _LANES)
    w_p = jnp.zeros((d_pad, nc_pad), jnp.bfloat16).at[:d, :nc].set(w.astype(jnp.bfloat16))
    b_p = jnp.zeros((1, nc_pad), jnp.float32).at[0, :nc].set(b.astype(jnp.float32))
    return w_p, b_p, tk


def _sde_adv_kernel(x_ref, w_ref, b_ref, o_ref):
    """Fused: rescale -> (diffusion purification) -> rescale -> linear head."""
    k = pl.program_id(0)

    # Output block is resident across the K axis (out index_map always (0,0)):
    # initialize it with the broadcast bias, then accumulate partial matmuls.
    @pl.when(k == 0)
    def _():
        o_ref[...] = jnp.broadcast_to(b_ref[...], o_ref.shape)

    # forward(): (x - 0.5) * 2  — map [0,1] -> [-1,1]
    x_in = (x_ref[...] - 0.5) * 2.0

    # TODO(synk): runner.image_editing_sample (GuidedDiffusion / SDE purifier) is an
    # external pretrained score network; modeled here as identity purification.
    x_re = x_in

    # classifier input: (x_re + 1) * 0.5  — map [-1,1] -> [0,1]
    # (VPU filler; fully hidden under the HBM-bound weight stream.)
    x_cls = (x_re + 1.0) * 0.5

    # Linear classifier on the MXU: bf16 operands, f32 accumulation into o_ref.
    o_ref[...] += jnp.dot(
        x_cls.astype(jnp.bfloat16), w_ref[...], preferred_element_type=jnp.float32
    )


def sde_adv_model_forward(x, w_p, b_p, tk):
    """x: [B, C, H, W] float32 in [0,1]; w_p/b_p/tk from prepare_classifier_params."""
    B, C, H, W = x.shape
    D = C * H * W
    d_pad, nc_pad = w_p.shape
    assert d_pad % tk == 0

    x_flat = x.reshape(B, D).astype(jnp.float32)
    if d_pad != D:
        # Padded K rows of w are zero, so the pad value is inert.
        x_flat = jnp.pad(x_flat, ((0, 0), (0, d_pad - D)))

    num_k = d_pad // tk

    # TODO(synk): on v7x (2 TensorCores), split the K range across cores
    # (core-parallel leading grid axis / core_map) and sum the two partial
    # outputs to use both per-TC HBM paths.
    out = pl.pallas_call(
        _sde_adv_kernel,
        out_shape=jax.ShapeDtypeStruct((B, nc_pad), jnp.float32),
        grid_spec=pltpu.PrefetchScalarGridSpec(
            num_scalar_prefetch=0,
            grid=(num_k,),
            in_specs=[
                pl.BlockSpec((B, tk), lambda k: (0, k)),        # activation K tile
                pl.BlockSpec((tk, nc_pad), lambda k: (k, 0)),   # bf16 weight K tile
                pl.BlockSpec((1, nc_pad), lambda k: (0, 0)),    # bias (resident)
            ],
            out_specs=pl.BlockSpec((B, nc_pad), lambda k: (0, 0)),
        ),
        compiler_params=pltpu.CompilerParams(dimension_semantics=("arbitrary",)),
    )(x_flat, w_p, b_p)

    return out[:, :NUM_CLASSES]


def _reference_forward(x, w, b):
    """Pure-JAX reference of the same (synthetic) forward, bf16-matmul matched."""
    B = x.shape[0]
    x_in = (x - 0.5) * 2.0
    x_re = x_in  # identity purification stand-in
    x_cls = ((x_re + 1.0) * 0.5).reshape(B, -1)
    return (
        jnp.dot(
            x_cls.astype(jnp.bfloat16),
            w.astype(jnp.bfloat16),
            preferred_element_type=jnp.float32,
        )
        + b
    )


if __name__ == "__main__":
    key = jax.random.PRNGKey(0)
    kx, kw, kb = jax.random.split(key, 3)

    B, C, H, W = 2, 4, 16, 16
    D = C * H * W

    x = jax.random.uniform(kx, (B, C, H, W), jnp.float32)            # pixels in [0,1]
    w = jax.random.normal(kw, (D, NUM_CLASSES), jnp.float32) * 0.02   # synthetic classifier
    b = jax.random.normal(kb, (NUM_CLASSES,), jnp.float32) * 0.01

    # One-time init-path weight prep (padding + bf16 cast), hoisted out of forward.
    w_p, b_p, tk = prepare_classifier_params(w, b)

    # NOTE: self.counter buffer / host-side prints / timing are stateful side
    # effects with no pure-JAX equivalent; they do not affect the returned logits.
    out = sde_adv_model_forward(x, w_p, b_p, tk)
    out = jax.block_until_ready(out)

    ref = _reference_forward(x, w, b)
    assert out.shape == (B, NUM_CLASSES)
    assert jnp.allclose(out, ref, atol=1e-3, rtol=1e-3), (out, ref)

    print("KERNEL_OK")
</pallas_src>

<mosaic_0001>
module attributes {stable_mosaic.version = 11 : i64} {
  func.func @_sde_adv_kernel(%arg0: i32, %arg1: memref<2x1024xf32, #tpu.memory_space<vmem>>, %arg2: memref<1024x128xbf16, #tpu.memory_space<vmem>>, %arg3: memref<1x128xf32, #tpu.memory_space<vmem>>, %arg4: memref<2x128xf32, #tpu.memory_space<vmem>>) attributes {dimension_semantics = [#tpu.dimension_semantics<arbitrary>], iteration_bounds = array<i64: 1>, scalar_prefetch = 0 : i64, scratch_operands = 0 : i64, tpu.core_type = #tpu.core_type<tc>, window_params = [{transform_indices = @transform_0, window_bounds = array<i64: 2, 1024>}, {transform_indices = @transform_1, window_bounds = array<i64: 1024, 128>}, {pipeline_mode = #tpu.pipeline_mode<synchronous>, transform_indices = @transform_2, window_bounds = array<i64: 1, 128>}, {pipeline_mode = #tpu.pipeline_mode<synchronous>, transform_indices = @transform_3, window_bounds = array<i64: 2, 128>}]} {
    %c0_i32 = arith.constant 0 : i32
    %0 = arith.cmpi eq, %arg0, %c0_i32 : i32
    %1 = arith.extui %0 : i1 to i32
    %c0_i32_0 = arith.constant 0 : i32
    %2 = arith.cmpi ne, %1, %c0_i32_0 : i32
    scf.if %2 {
      %c0_12 = arith.constant 0 : index
      %c0_13 = arith.constant 0 : index
      %18 = vector.load %arg3[%c0_12, %c0_13] : memref<1x128xf32, #tpu.memory_space<vmem>>, vector<1x128xf32>
      %19 = vector.shape_cast %18 : vector<1x128xf32> to vector<1x128xf32>
      %20 = vector.broadcast %19 : vector<1x128xf32> to vector<2x128xf32>
      %c0_14 = arith.constant 0 : index
      %c0_15 = arith.constant 0 : index
      %21 = vector.load %arg4[%c0_14, %c0_15] : memref<2x128xf32, #tpu.memory_space<vmem>>, vector<2x128xf32>
      tpu.vector_store %arg4[%c0_14, %c0_15], %20 {strides = array<i32>} : memref<2x128xf32, #tpu.memory_space<vmem>>, vector<2x128xf32>,
    } else {
    }
    %c0 = arith.constant 0 : index
    %c0_1 = arith.constant 0 : index
    %3 = vector.load %arg1[%c0, %c0_1] : memref<2x1024xf32, #tpu.memory_space<vmem>>, vector<2x1024xf32>
    %cst = arith.constant 5.000000e-01 : f32
    %4 = vector.broadcast %cst : f32 to vector<2x1024xf32>
    %5 = arith.subf %3, %4 : vector<2x1024xf32>
    %cst_2 = arith.constant 2.000000e+00 : f32
    %6 = vector.broadcast %cst_2 : f32 to vector<2x1024xf32>
    %7 = arith.mulf %5, %6 : vector<2x1024xf32>
    %cst_3 = arith.constant 1.000000e+00 : f32
    %8 = vector.broadcast %cst_3 : f32 to vector<2x1024xf32>
    %9 = arith.addf %7, %8 : vector<2x1024xf32>
    %cst_4 = arith.constant 5.000000e-01 : f32
    %10 = vector.broadcast %cst_4 : f32 to vector<2x1024xf32>
    %11 = arith.mulf %9, %10 : vector<2x1024xf32>
    %c0_5 = arith.constant 0 : index
    %c0_6 = arith.constant 0 : index
    %12 = vector.load %arg4[%c0_5, %c0_6] : memref<2x128xf32, #tpu.memory_space<vmem>>, vector<2x128xf32>
    %13 = arith.truncf %11 : vector<2x1024xf32> to vector<2x1024xbf16>
    %c0_7 = arith.constant 0 : index
    %c0_8 = arith.constant 0 : index
    %14 = vector.load %arg2[%c0_7, %c0_8] : memref<1024x128xbf16, #tpu.memory_space<vmem>>, vector<1024x128xbf16>
    %cst_9 = arith.constant dense<0.000000e+00> : vector<2x128xf32>
    %15 = tpu.matmul %13, %14, %cst_9 {dimension_numbers = #tpu.dot_dimension_numbers<[1], [0], [0], [1], [0, 0, 1, 1], [], []>} : vector<2x1024xbf16>, vector<1024x128xbf16>, vector<2x128xf32> -> vector<2x128xf32>
    %16 = arith.addf %12, %15 : vector<2x128xf32>
    %c0_10 = arith.constant 0 : index
    %c0_11 = arith.constant 0 : index
    %17 = vector.load %arg4[%c0_10, %c0_11] : memref<2x128xf32, #tpu.memory_space<vmem>>, vector<2x128xf32>
    tpu.vector_store %arg4[%c0_10, %c0_11], %16 {strides = array<i32>} : memref<2x128xf32, #tpu.memory_space<vmem>>, vector<2x128xf32>,
    return
  }
  func.func @transform_0(%arg0: i32) -> (i32, i32) {
    %c0_i32 = arith.constant 0 : i32
    %c0_i32_0 = arith.constant 0 : i32
    return %c0_i32, %arg0 : i32, i32
  }
  func.func @transform_1(%arg0: i32) -> (i32, i32) {
    %c0_i32 = arith.constant 0 : i32
    %c0_i32_0 = arith.constant 0 : i32
    return %arg0, %c0_i32 : i32, i32
  }
  func.func @transform_2(%arg0: i32) -> (i32, i32) {
    %c0_i32 = arith.constant 0 : i32
    %c0_i32_0 = arith.constant 0 : i32
    %c0_i32_1 = arith.constant 0 : i32
    return %c0_i32, %c0_i32_0 : i32, i32
  }
  func.func @transform_3(%arg0: i32) -> (i32, i32) {
    %c0_i32 = arith.constant 0 : i32
    %c0_i32_0 = arith.constant 0 : i32
    %c0_i32_1 = arith.constant 0 : i32
    return %c0_i32, %c0_i32_0 : i32, i32
  }
}

</mosaic_0001>

<bundles_post_ra>
// kernel: tpu_custom_call.1
= control target key start
LH: loop header
LB: loop body
LE: loop exit
PB: predicated region body
PF: predicated region fallthrough
CT: control target
= control target key end

     0   :  { %8 = vsyncpa [#allocation3], 0  ;;  %s1173_s0 = inlined_call_operand.hbm [shape: f32[2,1024], index: 0, kind: input, shape index: {}]   ;;  %s1174_s1 = inlined_call_operand.hbm [shape: bf16[1024,128], index: 1, kind: input, shape index: {}]   ;;  %s1175_s2 = inlined_call_operand.vmem [shape: f32[1,128], index: 2, kind: input, shape index: {}]   ;;  %s1176_s3 = inlined_call_operand.hbm [shape: f32[2,128], index: 3, kind: output, shape index: {}]  }
   0x1   :  { %9 = vsyncpa [#allocation6], 0 }
   0x2   :  { %10 = vsyncpa [#allocation4], 0  ;;  %s16_s14 = sshll.u32 %s1173_s0, 4  ;;  %s1136_s15 = smov [#allocation2]   ;;  %s17_s14 = int_to_ptr.hbm [resolvable:$true] %s16_s14 }
   0x3   :  { %s18_s16 = sshll.u32 %s1136_s15, 4  ;;  %s26_s19 = sshll.u32 %s1174_s1, 4  ;;  %s19_s16 = int_to_ptr.vmem [resolvable:$true] %s18_s16  ;;  %s27_s19 = int_to_ptr.hbm [resolvable:$true] %s26_s19 }
   0x4   :  { %21 = dma.hbm_to_vmem [thread:$0]  %s17_s14, 256, %s19_s16, [#allocation3]  }
   0x5   :  { %s1137_s20 = smov [#allocation5]   ;;  %s1138_s22 = smov 64  }
   0x6   :  { %s28_s21 = sshll.u32 %s1137_s20, 4  ;;  %s1139_s23 = smov 4   ;;  %s29_s21 = int_to_ptr.vmem [resolvable:$true] %s28_s21 }
   0x7   :  { %34 = dma.hbm_to_vmem [thread:$0]  %s27_s19, 8192, %s29_s21, [#allocation6], %s1138_s22, %s1138_s22, %s1139_s23  }
   0x8   :  { %1130 = dma.done.wait [#allocation3], 256  }
   0x9   :  { %1131 = vsyncadd [#allocation3], 4294967040 }
   0xa   :  { %1132 = dma.done.wait [#allocation6], 8192  }
   0xb   :  { %1133 = vsyncadd [#allocation6], 4294959104  ;;  %v995_v0 = vld [vmem:[#allocation5 + $0x38] sm:$0xff]  ;;  %v994_v4 = vld [vmem:[#allocation5 + $0x30] sm:$0xff]  ;;  %s719_s27 = sshll.u32 %s1176_s3, 4  ;;  %s720_s27 = int_to_ptr.hbm [resolvable:$true] %s719_s27 }
   0xc   :  { %v1003_v1 = vld [vmem:[#allocation5 + $0x78] sm:$0xff]  ;;  %606 = vmatpush.bf16.msra.mxu0 %v995_v0  ;;  %v1002_v5 = vld [vmem:[#allocation5 + $0x70] sm:$0xff]  ;;  %v993_v8 = vld [vmem:[#allocation5 + $0x28] sm:$0xff] }
   0xd   :  { %v1011_v2 = vld [vmem:[#allocation5 + $0xb8] sm:$0xff]  ;;  %619 = vmatpush.bf16.msra.mxu1 %v1003_v1  ;;  %v1010_v6 = vld [vmem:[#allocation5 + $0xb0] sm:$0xff]  ;;  %v1001_v9 = vld [vmem:[#allocation5 + $0x68] sm:$0xff] }
   0xe   :  { %v1019_v3 = vld [vmem:[#allocation5 + $0xf8] sm:$0xff]  ;;  %632 = vmatpush.bf16.msra.mxu2 %v1011_v2  ;;  %v1018_v7 = vld [vmem:[#allocation5 + $0xf0] sm:$0xff]  ;;  %v1009_v10 = vld [vmem:[#allocation5 + $0xa8] sm:$0xff] }
   0xf   :  { %645 = vmatpush.bf16.msra.mxu3 %v1019_v3  ;;  %v1017_v11 = vld [vmem:[#allocation5 + $0xe8] sm:$0xff]  ;;  %v992_v12 = vld [vmem:[#allocation5 + $0x20] sm:$0xff]  ;;  %v54_v16 = vld [vmem:[#allocation2] sm:$0xff] }
  0x10   :  { %607 = vmatpush.bf16.msra.mxu0 %v994_v4  ;;  %v1000_v13 = vld [vmem:[#allocation5 + $0x60] sm:$0xff]  ;;  %v991_v17 = vld [vmem:[#allocation5 + $0x18] sm:$0xff]  ;;  %v730_v19 = vadd.f32 -0.5, %v54_v16  ;;  %v990_v23 = vld [vmem:[#allocation5 + $0x10] sm:$0xff] }
  0x11   :  { %620 = vmatpush.bf16.msra.mxu1 %v1002_v5  ;;  %v1008_v14 = vld [vmem:[#allocation5 + $0xa0] sm:$0xff]  ;;  %v999_v18 = vld [vmem:[#allocation5 + $0x58] sm:$0xff]  ;;  %v998_v24 = vld [vmem:[#allocation5 + $0x50] sm:$0xff] }
  0x12   :  { %633 = vmatpush.bf16.msra.mxu2 %v1010_v6  ;;  %v1016_v15 = vld [vmem:[#allocation5 + $0xe0] sm:$0xff]  ;;  %v1007_v20 = vld [vmem:[#allocation5 + $0x98] sm:$0xff]  ;;  %v58_v22 = vmul.f32 2.0, %v730_v19  ;;  %v1006_v27 = vld [vmem:[#allocation5 + $0x90] sm:$0xff] }
  0x13   :  { %646 = vmatpush.bf16.msra.mxu3 %v1018_v7  ;;  %v1015_v21 = vld [vmem:[#allocation5 + $0xd8] sm:$0xff]  ;;  %v1014_v28 = vld [vmem:[#allocation5 + $0xd0] sm:$0xff]  ;;  %v989_v32 = vld [vmem:[#allocation5 + $0x8] sm:$0xff] }
  0x14   :  { %608 = vmatpush.bf16.msra.mxu0 %v993_v8  ;;  %v60_v25 = vadd.f32 1.0, %v58_v22  ;;  %v55_v26 = vld [vmem:[#allocation2 + $0x8] sm:$0xff]  ;;  %v997_v33 = vld [vmem:[#allocation5 + $0x48] sm:$0xff]  ;;  %v988_v38 = vld [vmem:[#allocation5] sm:$0xff] }
  0x15   :  { %621 = vmatpush.bf16.msra.mxu1 %v1001_v9  ;;  %v731_v29 = vadd.f32 -0.5, %v55_v26  ;;  %v1005_v34 = vld [vmem:[#allocation5 + $0x88] sm:$0xff]  ;;  %v996_v39 = vld [vmem:[#allocation5 + $0x40] sm:$0xff]  ;;  %v1027_v42 = vld [vmem:[#allocation5 + $0x138] sm:$0xff] }
  0x16   :  { %634 = vmatpush.bf16.msra.mxu2 %v1009_v10  ;;  %v62_v30 = vmul.f32 0.5, %v60_v25  ;;  %v1013_v35 = vld [vmem:[#allocation5 + $0xc8] sm:$0xff]  ;;  %v1004_v40 = vld [vmem:[#allocation5 + $0x80] sm:$0xff]  ;;  %v1035_v43 = vld [vmem:[#allocation5 + $0x178] sm:$0xff] }
  0x17   :  { %647 = vmatpush.bf16.msra.mxu3 %v1017_v11  ;;  %v59_v31 = vmul.f32 2.0, %v731_v29  ;;  %v1012_v41 = vld [vmem:[#allocation5 + $0xc0] sm:$0xff]  ;;  %v1043_v44 = vld [vmem:[#allocation5 + $0x1b8] sm:$0xff]  ;;  %v1026_v54 = vld [vmem:[#allocation5 + $0x130] sm:$0xff] }
  0x18   :  { %609 = vmatpush.bf16.msra.mxu0 %v992_v12  ;;  %67 = vst [vmem:[#allocation1] ss:$4 sm:$0xff] %v62_v30  ;;  %v1051_v45 = vld [vmem:[#allocation5 + $0x1f8] sm:$0xff]  ;;  %v1034_v55 = vld [vmem:[#allocation5 + $0x170] sm:$0xff]  ;;  %v1025_v58 = vld [vmem:[#allocation5 + $0x128] sm:$0xff] }
  0x19   :  { %622 = vmatpush.bf16.msra.mxu1 %v1000_v13  ;;  %v61_v36 = vadd.f32 1.0, %v59_v31  ;;  %v1042_v56 = vld [vmem:[#allocation5 + $0x1b0] sm:$0xff]  ;;  %v1033_v59 = vld [vmem:[#allocation5 + $0x168] sm:$0xff]  ;;  %v1024_v62 = vld [vmem:[#allocation5 + $0x120] sm:$0xff] }
  0x1a   :  { %635 = vmatpush.bf16.msra.mxu2 %v1008_v14  ;;  %v1050_v57 = vld [vmem:[#allocation5 + $0x1f0] sm:$0xff]  ;;  %v1041_v60 = vld [vmem:[#allocation5 + $0x1a8] sm:$0xff]  ;;  %v1032_v63 = vld [vmem:[#allocation5 + $0x160] sm:$0xff] }
  0x1b   :  { %648 = vmatpush.bf16.msra.mxu3 %v1016_v15  ;;  %v63_v37 = vmul.f32 0.5, %v61_v36  ;;  %v1049_v61 = vld [vmem:[#allocation5 + $0x1e8] sm:$0xff]  ;;  %v1040_v0 = vld [vmem:[#allocation5 + $0x1a0] sm:$0xff]  ;;  %v1023_v2 = vld [vmem:[#allocation5 + $0x118] sm:$0xff] }
  0x1c   :  { %610 = vmatpush.bf16.msra.mxu0 %v991_v17  ;;  %v1048_v1 = vld [vmem:[#allocation5 + $0x1e0] sm:$0xff]  ;;  %v1031_v3 = vld [vmem:[#allocation5 + $0x158] sm:$0xff]  ;;  %v1022_v6 = vld [vmem:[#allocation5 + $0x110] sm:$0xff] }
  0x1d   :  { %623 = vmatpush.bf16.msra.mxu1 %v999_v18  ;;  %69 = vst [vmem:[#allocation1 + $0x20] ss:$4 sm:$0xff] %v63_v37  ;;  %v1039_v4 = vld [vmem:[#allocation5 + $0x198] sm:$0xff]  ;;  %v1030_v7 = vld [vmem:[#allocation5 + $0x150] sm:$0xff]  ;;  %v1021_v10 = vld [vmem:[#allocation5 + $0x108] sm:$0xff] }
  0x1e   :  { %636 = vmatpush.bf16.msra.mxu2 %v1007_v20  ;;  %v1047_v5 = vld [vmem:[#allocation5 + $0x1d8] sm:$0xff]  ;;  %v1038_v8 = vld [vmem:[#allocation5 + $0x190] sm:$0xff]  ;;  %v1029_v11 = vld [vmem:[#allocation5 + $0x148] sm:$0xff] }
  0x1f   :  { %649 = vmatpush.bf16.msra.mxu3 %v1015_v21  ;;  %v72_v46 = vld.sshfl [vmem:[#allocation1 + $0x10] sm:$0xff pattern:$0x73625140]  ;;  %v73_v47 = vld.sshfl [vmem:[#allocation1 + $0x18] sm:$0xff pattern:$0x73625140] }
  0x20   :  { %611 = vmatpush.bf16.msra.mxu0 %v990_v23  ;;  %v88_v48 = vpack.c.bf16 %v72_v46, %v72_v46  ;;  %v89_v49 = vpack.c.bf16 %v73_v47, %v73_v47  ;;  %v70_v50 = vld.sshfl [vmem:[#allocation1] sm:$0xff pattern:$0x73625140]  ;;  %v71_v51 = vld.sshfl [vmem:[#allocation1 + $0x8] sm:$0xff pattern:$0x73625140] }
  0x21   :  { %624 = vmatpush.bf16.msra.mxu1 %v998_v24  ;;  %v86_v52 = vpack.c.bf16 %v70_v50, %v70_v50  ;;  %v87_v53 = vpack.c.bf16 %v71_v51, %v71_v51  ;;  %v1046_v9 = vld [vmem:[#allocation5 + $0x1d0] sm:$0xff]  ;;  %v1037_v12 = vld [vmem:[#allocation5 + $0x188] sm:$0xff]  ;;  %v1020_v14 = vld [vmem:[#allocation5 + $0x100] sm:$0xff] }
  0x22   :  { %637 = vmatpush.bf16.msra.mxu2 %v1006_v27  ;;  %v1045_v13 = vld [vmem:[#allocation5 + $0x1c8] sm:$0xff]  ;;  %v1028_v15 = vld [vmem:[#allocation5 + $0x140] sm:$0xff] }
  0x23   :  { %650 = vmatpush.bf16.msra.mxu3 %v1014_v28  ;;  %v1036_v16 = vld [vmem:[#allocation5 + $0x180] sm:$0xff]  ;;  %v1057_v26 = vld [vmem:[%s1175_s2] ss:$0 sm:$0xff]  ;;  %s1140_s2 = smov [#allocation7]  }
  0x24   :  { %612 = vmatpush.bf16.msra.mxu0 %v989_v32  ;;  %v1044_v17 = vld [vmem:[#allocation5 + $0x1c0] sm:$0xff]  ;;  %v74_v18 = vld.sshfl [vmem:[#allocation1 + $0x20] sm:$0xff pattern:$0x73625140]  ;;  %53 = vst [vmem:[#allocation7] sm:$0x3] %v1057_v26 }
  0x25   :  { %625 = vmatpush.bf16.msra.mxu1 %v997_v33  ;;  %v75_v19 = vld.sshfl [vmem:[#allocation1 + $0x28] sm:$0xff pattern:$0x73625140]  ;;  %v76_v20 = vld.sshfl [vmem:[#allocation1 + $0x30] sm:$0xff pattern:$0x73625140]  ;;  %v90_v22 = vpack.c.bf16 %v74_v18, %v74_v18 }
  0x26   :  { %638 = vmatpush.bf16.msra.mxu2 %v1005_v34  ;;  %v77_v21 = vld.sshfl [vmem:[#allocation1 + $0x38] sm:$0xff pattern:$0x73625140]  ;;  %v91_v23 = vpack.c.bf16 %v75_v19, %v75_v19  ;;  %v92_v24 = vpack.c.bf16 %v76_v20, %v76_v20  ;;  %s717_s24 = sshll.u32 %s1140_s2, 4  ;;  %s718_s24 = int_to_ptr.vmem [resolvable:$true] %s717_s24 }
  0x27   :  { %651 = vmatpush.bf16.msra.mxu3 %v1013_v35  ;;  %v93_v25 = vpack.c.bf16 %v77_v21, %v77_v21 }
  0x28   :  { %613 = vmatpush.bf16.msra.mxu0 %v988_v38 }
  0x29   :  { %626 = vmatpush.bf16.msra.mxu1 %v996_v39 }
  0x2a   :  { %639 = vmatpush.bf16.msra.mxu2 %v1004_v40 }
  0x2b   :  { %652 = vmatpush.bf16.msra.mxu3 %v1012_v41  ;;  %614 = vmatmul.bf16.vlgmr.msra.gmra.mxu0 %v86_v52  ;;  %v64_v47 = vld [vmem:[#allocation7] sm:$0x3] }
  0x2c   :  { %658 = vmatpush.bf16.msrb.mxu0 %v1027_v42  ;;  %627 = vmatmul.bf16.vlgmr.msra.gmra.mxu1 %v87_v53 }
  0x2d   :  { %671 = vmatpush.bf16.msrb.mxu1 %v1035_v43  ;;  %640 = vmatmul.bf16.vlgmr.msra.gmra.mxu2 %v88_v48 }
  0x2e   :  { %684 = vmatpush.bf16.msrb.mxu2 %v1043_v44  ;;  %653 = vmatmul.bf16.vlgmr.msra.gmra.mxu3 %v89_v49 }
  0x2f   :  { %697 = vmatpush.bf16.msrb.mxu3 %v1051_v45 }
  0x30   :  { %659 = vmatpush.bf16.msrb.mxu0 %v1026_v54 }
  0x31   :  { %672 = vmatpush.bf16.msrb.mxu1 %v1034_v55 }
  0x32   :  { %685 = vmatpush.bf16.msrb.mxu2 %v1042_v56 }
  0x33   :  { %698 = vmatpush.bf16.msrb.mxu3 %v1050_v57 }
  0x34   :  { %660 = vmatpush.bf16.msrb.mxu0 %v1025_v58 }
  0x35   :  { %673 = vmatpush.bf16.msrb.mxu1 %v1033_v59 }
  0x36   :  { %686 = vmatpush.bf16.msrb.mxu2 %v1041_v60 }
  0x37   :  { %699 = vmatpush.bf16.msrb.mxu3 %v1049_v61 }
  0x38   :  { %661 = vmatpush.bf16.msrb.mxu0 %v1024_v62 }
  0x39   :  { %674 = vmatpush.bf16.msrb.mxu1 %v1032_v63 }
  0x3a   :  { %687 = vmatpush.bf16.msrb.mxu2 %v1040_v0 }
  0x3b   :  { %700 = vmatpush.bf16.msrb.mxu3 %v1048_v1 }
  0x3c   :  { %662 = vmatpush.bf16.msrb.mxu0 %v1023_v2 }
  0x3d   :  { %675 = vmatpush.bf16.msrb.mxu1 %v1031_v3 }
  0x3e   :  { %688 = vmatpush.bf16.msrb.mxu2 %v1039_v4 }
  0x3f   :  { %701 = vmatpush.bf16.msrb.mxu3 %v1047_v5 }
  0x40   :  { %663 = vmatpush.bf16.msrb.mxu0 %v1022_v6 }
  0x41   :  { %676 = vmatpush.bf16.msrb.mxu1 %v1030_v7 }
  0x42   :  { %689 = vmatpush.bf16.msrb.mxu2 %v1038_v8 }
  0x43   :  { %702 = vmatpush.bf16.msrb.mxu3 %v1046_v9 }
  0x44   :  { %664 = vmatpush.bf16.msrb.mxu0 %v1021_v10 }
  0x45   :  { %677 = vmatpush.bf16.msrb.mxu1 %v1029_v11 }
  0x46   :  { %690 = vmatpush.bf16.msrb.mxu2 %v1037_v12 }
  0x47   :  { %703 = vmatpush.bf16.msrb.mxu3 %v1045_v13 }
  0x48   :  { %665 = vmatpush.bf16.msrb.mxu0 %v1020_v14 }
  0x49   :  { %678 = vmatpush.bf16.msrb.mxu1 %v1028_v15 }
  0x4a   :  { %691 = vmatpush.bf16.msrb.mxu2 %v1036_v16 }
  0x4b   :  { %704 = vmatpush.bf16.msrb.mxu3 %v1044_v17  ;;  %666 = vmatmul.bf16.vlgmr.msrb.gmra.mxu0 %v90_v22 }
  0x4c   :  { %679 = vmatmul.bf16.vlgmr.msrb.gmra.mxu1 %v91_v23 }
  0x4d   :  { %692 = vmatmul.bf16.vlgmr.msrb.gmra.mxu2 %v92_v24 }
  0x4e   :  { %705 = vmatmul.bf16.vlgmr.msrb.gmra.mxu3 %v93_v25 }
  0xa8   :  { %v615_v27 = vpop.f32.mrf.mxu0 }
  0xa9   :  { %v628_v28 = vpop.f32.mrf.mxu1 }
  0xaa   :  { %v629_v35 = vadd.f32 %v628_v28, %v615_v27 }
  0xb0   :  { %v641_v29 = vpop.f32.mrf.mxu2  ;;  %v617_v31 = vpop.f32.mrf.mxu0 }
  0xb1   :  { %v654_v30 = vpop.f32.mrf.mxu3  ;;  %v630_v32 = vpop.f32.mrf.mxu1  ;;  %v642_v36 = vadd.f32 %v641_v29, %v629_v35 }
  0xb3   :  { %v655_v37 = vadd.f32 %v654_v30, %v642_v36 }
  0xb8   :  { %v643_v33 = vpop.f32.mrf.mxu2 }
  0xb9   :  { %v656_v34 = vpop.f32.mrf.mxu3 }
  0xc8   :  { %v667_v38 = vpop.f32.mrf.mxu0 }
  0xc9   :  { %v680_v39 = vpop.f32.mrf.mxu1  ;;  %v668_v40 = vadd.f32 %v667_v38, %v655_v37 }
  0xcb   :  { %v681_v41 = vadd.f32 %v680_v39, %v668_v40 }
  0xd0   :  { %v693_v42 = vpop.f32.mrf.mxu2  ;;  %v669_v45 = vpop.f32.mrf.mxu0 }
  0xd1   :  { %v706_v43 = vpop.f32.mrf.mxu3  ;;  %v694_v44 = vadd.f32 %v693_v42, %v681_v41  ;;  %v682_v46 = vpop.f32.mrf.mxu1 }
  0xd3   :  { %v707_v48 = vadd.f32 %v706_v43, %v694_v44 }
  0xd5   :  { %v710_v49 = vadd.f32 %v707_v48, %v64_v47 }
  0xd7   :  { %711 = vst [vmem:[#allocation7] sm:$0x3] %v710_v49 }
  0xd8   :  { %v695_v50 = vpop.f32.mrf.mxu2  ;;  %722 = dma.vmem_to_hbm [thread:$0]  %s718_s24, 32, %s720_s27, [#allocation4]  }
  0xd9   :  { %v708_v51 = vpop.f32.mrf.mxu3 }
  0xda   :  { %1134 = dma.done.wait [#allocation4], 32  }
  0xdb   :  { %1135 = vsyncadd [#allocation4], 4294967264 }
  0xdc   :  { %727 = vsyncpa [#allocation3], 1 }
  0xdd   :  { %728 = vsyncpa [#allocation6], 1 }
  0xde   :  { %729 = vsyncpa [#allocation4], 1 }

</bundles_post_ra>
